<compile_context>
chip_gen: v7x
topology: tpu7x:2x2x1
jax: 0.10.0
libtpu: 0.0.40
codegen_flags: <defaults>
</compile_context>

<pallas_src>
import jax
import jax.numpy as jnp
from jax.experimental import pallas as pl
from jax.experimental.pallas import tpu as pltpu

F_IN, H1, H2, F_OUT = 19, 32, 16, 3


def _round_up(a, m):
    return (a + m - 1) // m * m


def _cdiv(a, b):
    return (a + b - 1) // b


def policy_mlp_kernel(x_ref, w1_ref, b1_ref, w2_ref, b2_ref, w3_ref, b3_ref, o_ref):
    # x tile is batch-major (TB, F_IN); activations are feature-major
    # (features, TB) so the batch lives on the 128-lane axis and the (3, TB)
    # output stores are lane-dense.
    cdt = w1_ref.dtype                       # MXU input dtype (bf16)
    xt = x_ref[...].astype(cdt)              # cast in-kernel: no wrapper pre-pass over x

    # fc1: W1 (32,19) contracted against X (TB,19) along both minor dims
    # (NT matmul) -> feature-major (32, TB); Mosaic handles the transpose.
    h1 = jax.lax.dot_general(
        w1_ref[...], xt,
        dimension_numbers=(((1,), (1,)), ((), ())),
        preferred_element_type=jnp.float32,
    )
    h1 = jnp.maximum(h1 + b1_ref[...], 0.0)

    # fc2 + relu -> (16, TB)
    h2 = jnp.dot(w2_ref[...], h1.astype(cdt), preferred_element_type=jnp.float32)
    h2 = jnp.maximum(h2 + b2_ref[...], 0.0)

    # fc3 -> logits (3, TB)
    logits = jnp.dot(w3_ref[...], h2.astype(cdt), preferred_element_type=jnp.float32)
    logits = logits + b3_ref[...]

    # Numerically stable softmax over the 3 feature rows; explicit 3-term
    # max/sum on (1, TB) row slices (pure VPU, no axis-0 XLU reduce).
    r0, r1, r2 = logits[0:1, :], logits[1:2, :], logits[2:3, :]
    m = jnp.maximum(jnp.maximum(r0, r1), r2)
    e = jnp.exp(logits - m)
    s = e[0:1, :] + e[1:2, :] + e[2:3, :]
    # Exact normalization (consumers may sample from the distribution).
    o_ref[...] = e / s


def _choose_batch_tiling(B, tb_max):
    # Large tiles amortize the per-grid-step overhead; derive TB from the
    # number of tiles so batch padding is capped at <128 rows.
    n_tiles = max(_cdiv(B, tb_max), 1)
    if B > 2 * 128 and n_tiles < 2:
        n_tiles = 2            # >=2 grid steps so v7x's two TensorCores both get work
    if n_tiles > 1 and n_tiles % 2 == 1:
        n_tiles += 1           # balanced sharding across 2 TCs
    TB = max(128, _round_up(_cdiv(B, n_tiles), 128))
    grid = _cdiv(B, TB)
    return TB, grid


def policy_network_forward(x, params, *, tb_max=32768,
                           compute_dtype=jnp.bfloat16,
                           feature_major_out=False):
    """x: (B, 19) float, batch-major as PyTorch hands it.
    params: PyTorch-native (w (out,in), b (out,)) for the 3 linear layers.
    Returns softmax probabilities: (B, 3) f32 (or (3, B) if feature_major_out).
    """
    w1, b1, w2, b2, w3, b3 = params
    B = x.shape[0]
    TB, grid = _choose_batch_tiling(B, tb_max)

    # Tiny one-off casts; these stay VMEM-resident across the whole grid.
    w1c = w1.astype(compute_dtype)
    w2c = w2.astype(compute_dtype)
    w3c = w3.astype(compute_dtype)
    b1c = b1.reshape(H1, 1).astype(jnp.float32)
    b2c = b2.reshape(H2, 1).astype(jnp.float32)
    b3c = b3.reshape(F_OUT, 1).astype(jnp.float32)

    const = lambda i: (0, 0)

    # Scoped-VMEM estimate (x + out tiles, double-buffered); only raise the
    # limit when a caller pushes tb_max past the default budget.
    x_itemsize = jnp.dtype(x.dtype).itemsize
    need = 2 * TB * (F_IN * x_itemsize + F_OUT * 4) + (1 << 20)
    cp_kwargs = dict(dimension_semantics=("parallel",))
    if need > 12 * 1024 * 1024:
        cp_kwargs["vmem_limit_bytes"] = min(2 * need, 48 * 1024 * 1024)

    out_t = pl.pallas_call(
        policy_mlp_kernel,
        out_shape=jax.ShapeDtypeStruct((F_OUT, B), jnp.float32),
        grid_spec=pltpu.PrefetchScalarGridSpec(
            num_scalar_prefetch=0,
            grid=(grid,),
            in_specs=[
                pl.BlockSpec((TB, F_IN), lambda i: (i, 0)),   # x: streamed over batch
                pl.BlockSpec((H1, F_IN), const),              # w1 (VMEM-resident)
                pl.BlockSpec((H1, 1), const),                 # b1
                pl.BlockSpec((H2, H1), const),                # w2
                pl.BlockSpec((H2, 1), const),                 # b2
                pl.BlockSpec((F_OUT, H2), const),             # w3
                pl.BlockSpec((F_OUT, 1), const),              # b3
            ],
            out_specs=pl.BlockSpec((F_OUT, TB), lambda i: (0, i)),  # lane-dense output
        ),
        compiler_params=pltpu.CompilerParams(**cp_kwargs),
    )(x, w1c, b1c, w2c, b2c, w3c, b3c)

    if feature_major_out:
        return out_t                     # (3, B): avoids the final transpose entirely
    # PyTorch-compatible (B, 3); tiny (3*B) transpose.
    return out_t.T


def init_params(key):
    # Mimics PyTorch nn.Linear init: U(-1/sqrt(fan_in), 1/sqrt(fan_in)),
    # weights stored PyTorch-native as (out_features, in_features).
    def linear(key, fan_in, fan_out):
        kw, kb = jax.random.split(key)
        bound = 1.0 / jnp.sqrt(jnp.float32(fan_in))
        w = jax.random.uniform(kw, (fan_out, fan_in), jnp.float32, -bound, bound)
        b = jax.random.uniform(kb, (fan_out,), jnp.float32, -bound, bound)
        return w, b

    k1, k2, k3 = jax.random.split(key, 3)
    w1, b1 = linear(k1, F_IN, H1)
    w2, b2 = linear(k2, H1, H2)
    w3, b3 = linear(k3, H2, F_OUT)
    return w1, b1, w2, b2, w3, b3


if __name__ == "__main__":
    key = jax.random.PRNGKey(0)
    kx, kp = jax.random.split(key)

    params = init_params(kp)
    w1, b1, w2, b2, w3, b3 = params

    def ref_forward(xr):
        h1 = jax.nn.relu(xr @ w1.T + b1)
        h2 = jax.nn.relu(h1 @ w2.T + b2)
        return jax.nn.softmax(h2 @ w3.T + b3, axis=-1)

    # Small deterministic batch (module takes (B, 19)).
    B = 8
    x = jax.random.normal(kx, (B, F_IN), jnp.float32)
    out = jax.block_until_ready(policy_network_forward(x, params))
    ref = ref_forward(x)
    assert out.shape == (B, F_OUT), out.shape
    assert bool(jnp.all(jnp.isfinite(out)))
    assert jnp.allclose(jnp.sum(out, axis=-1), 1.0, atol=1e-3)
    # bf16 matmul inputs (f32 accumulation) -> loose-but-tight-enough tolerance.
    assert jnp.allclose(out, ref, atol=3e-2), float(jnp.max(jnp.abs(out - ref)))

    # Ragged multi-tile batch: exercises >=2 grid steps ("parallel" axis) and
    # the masked partial last tile.
    B2 = 300
    x2 = jax.random.normal(jax.random.PRNGKey(1), (B2, F_IN), jnp.float32)
    out2 = jax.block_until_ready(policy_network_forward(x2, params))
    ref2 = ref_forward(x2)
    assert out2.shape == (B2, F_OUT), out2.shape
    assert bool(jnp.all(jnp.isfinite(out2)))
    assert jnp.allclose(jnp.sum(out2, axis=-1), 1.0, atol=1e-3)
    assert jnp.allclose(out2, ref2, atol=3e-2), float(jnp.max(jnp.abs(out2 - ref2)))

    print("KERNEL_OK")
</pallas_src>

<mosaic_0001>
module attributes {stable_mosaic.version = 11 : i64} {
  func.func @policy_mlp_kernel(%arg0: i32, %arg1: memref<128x19xf32, #tpu.memory_space<vmem>>, %arg2: memref<32x19xbf16, #tpu.memory_space<vmem>>, %arg3: memref<32x1xf32, #tpu.memory_space<vmem>>, %arg4: memref<16x32xbf16, #tpu.memory_space<vmem>>, %arg5: memref<16x1xf32, #tpu.memory_space<vmem>>, %arg6: memref<3x16xbf16, #tpu.memory_space<vmem>>, %arg7: memref<3x1xf32, #tpu.memory_space<vmem>>, %arg8: memref<3x128xf32, #tpu.memory_space<vmem>>) attributes {dimension_semantics = [#tpu.dimension_semantics<parallel>], iteration_bounds = array<i64: 1>, scalar_prefetch = 0 : i64, scratch_operands = 0 : i64, tpu.core_type = #tpu.core_type<tc>, window_params = [{transform_indices = @transform_0, window_bounds = array<i64: 128, 19>}, {pipeline_mode = #tpu.pipeline_mode<synchronous>, transform_indices = @transform_1, window_bounds = array<i64: 32, 19>}, {pipeline_mode = #tpu.pipeline_mode<synchronous>, transform_indices = @transform_2, window_bounds = array<i64: 32, 1>}, {pipeline_mode = #tpu.pipeline_mode<synchronous>, transform_indices = @transform_3, window_bounds = array<i64: 16, 32>}, {pipeline_mode = #tpu.pipeline_mode<synchronous>, transform_indices = @transform_4, window_bounds = array<i64: 16, 1>}, {pipeline_mode = #tpu.pipeline_mode<synchronous>, transform_indices = @transform_5, window_bounds = array<i64: 3, 16>}, {pipeline_mode = #tpu.pipeline_mode<synchronous>, transform_indices = @transform_6, window_bounds = array<i64: 3, 1>}, {transform_indices = @transform_7, window_bounds = array<i64: 3, 128>}]} {
    %c0 = arith.constant 0 : index
    %c0_0 = arith.constant 0 : index
    %0 = vector.load %arg1[%c0, %c0_0] : memref<128x19xf32, #tpu.memory_space<vmem>>, vector<128x19xf32>
    %1 = arith.truncf %0 : vector<128x19xf32> to vector<128x19xbf16>
    %c0_1 = arith.constant 0 : index
    %c0_2 = arith.constant 0 : index
    %2 = vector.load %arg2[%c0_1, %c0_2] : memref<32x19xbf16, #tpu.memory_space<vmem>>, vector<32x19xbf16>
    %cst = arith.constant dense<0.000000e+00> : vector<32x128xf32>
    %3 = tpu.matmul %2, %1, %cst {dimension_numbers = #tpu.dot_dimension_numbers<[1], [1], [0], [0], [0, 0, 1, 0], [], []>} : vector<32x19xbf16>, vector<128x19xbf16>, vector<32x128xf32> -> vector<32x128xf32>
    %c0_3 = arith.constant 0 : index
    %c0_4 = arith.constant 0 : index
    %4 = vector.load %arg3[%c0_3, %c0_4] : memref<32x1xf32, #tpu.memory_space<vmem>>, vector<32x1xf32>
    %5 = vector.broadcast %4 : vector<32x1xf32> to vector<32x128xf32>
    %6 = arith.addf %3, %5 : vector<32x128xf32>
    %cst_5 = arith.constant 0.000000e+00 : f32
    %7 = vector.broadcast %cst_5 : f32 to vector<32x128xf32>
    %8 = arith.maximumf %6, %7 : vector<32x128xf32>
    %c0_6 = arith.constant 0 : index
    %c0_7 = arith.constant 0 : index
    %9 = vector.load %arg4[%c0_6, %c0_7] : memref<16x32xbf16, #tpu.memory_space<vmem>>, vector<16x32xbf16>
    %10 = arith.truncf %8 : vector<32x128xf32> to vector<32x128xbf16>
    %cst_8 = arith.constant dense<0.000000e+00> : vector<16x128xf32>
    %11 = tpu.matmul %9, %10, %cst_8 {dimension_numbers = #tpu.dot_dimension_numbers<[1], [0], [0], [1], [0, 0, 1, 1], [], []>} : vector<16x32xbf16>, vector<32x128xbf16>, vector<16x128xf32> -> vector<16x128xf32>
    %c0_9 = arith.constant 0 : index
    %c0_10 = arith.constant 0 : index
    %12 = vector.load %arg5[%c0_9, %c0_10] : memref<16x1xf32, #tpu.memory_space<vmem>>, vector<16x1xf32>
    %13 = vector.broadcast %12 : vector<16x1xf32> to vector<16x128xf32>
    %14 = arith.addf %11, %13 : vector<16x128xf32>
    %cst_11 = arith.constant 0.000000e+00 : f32
    %15 = vector.broadcast %cst_11 : f32 to vector<16x128xf32>
    %16 = arith.maximumf %14, %15 : vector<16x128xf32>
    %c0_12 = arith.constant 0 : index
    %c0_13 = arith.constant 0 : index
    %17 = vector.load %arg6[%c0_12, %c0_13] : memref<3x16xbf16, #tpu.memory_space<vmem>>, vector<3x16xbf16>
    %18 = arith.truncf %16 : vector<16x128xf32> to vector<16x128xbf16>
    %cst_14 = arith.constant dense<0.000000e+00> : vector<3x128xf32>
    %19 = tpu.matmul %17, %18, %cst_14 {dimension_numbers = #tpu.dot_dimension_numbers<[1], [0], [0], [1], [0, 0, 1, 1], [], []>} : vector<3x16xbf16>, vector<16x128xbf16>, vector<3x128xf32> -> vector<3x128xf32>
    %c0_15 = arith.constant 0 : index
    %c0_16 = arith.constant 0 : index
    %20 = vector.load %arg7[%c0_15, %c0_16] : memref<3x1xf32, #tpu.memory_space<vmem>>, vector<3x1xf32>
    %21 = vector.broadcast %20 : vector<3x1xf32> to vector<3x128xf32>
    %22 = arith.addf %19, %21 : vector<3x128xf32>
    %23 = vector.extract_strided_slice %22 {offsets = [0, 0], sizes = [1, 128], strides = [1, 1]} : vector<3x128xf32> to vector<1x128xf32>
    %24 = vector.extract_strided_slice %22 {offsets = [1, 0], sizes = [1, 128], strides = [1, 1]} : vector<3x128xf32> to vector<1x128xf32>
    %25 = vector.extract_strided_slice %22 {offsets = [2, 0], sizes = [1, 128], strides = [1, 1]} : vector<3x128xf32> to vector<1x128xf32>
    %26 = arith.maximumf %23, %24 : vector<1x128xf32>
    %27 = arith.maximumf %26, %25 : vector<1x128xf32>
    %28 = vector.broadcast %27 : vector<1x128xf32> to vector<3x128xf32>
    %29 = arith.subf %22, %28 : vector<3x128xf32>
    %30 = math.exp %29 : vector<3x128xf32>
    %31 = vector.extract_strided_slice %30 {offsets = [0, 0], sizes = [1, 128], strides = [1, 1]} : vector<3x128xf32> to vector<1x128xf32>
    %32 = vector.extract_strided_slice %30 {offsets = [1, 0], sizes = [1, 128], strides = [1, 1]} : vector<3x128xf32> to vector<1x128xf32>
    %33 = arith.addf %31, %32 : vector<1x128xf32>
    %34 = vector.extract_strided_slice %30 {offsets = [2, 0], sizes = [1, 128], strides = [1, 1]} : vector<3x128xf32> to vector<1x128xf32>
    %35 = arith.addf %33, %34 : vector<1x128xf32>
    %36 = vector.broadcast %35 : vector<1x128xf32> to vector<3x128xf32>
    %37 = arith.divf %30, %36 : vector<3x128xf32>
    %c0_17 = arith.constant 0 : index
    %c0_18 = arith.constant 0 : index
    %38 = vector.load %arg8[%c0_17, %c0_18] : memref<3x128xf32, #tpu.memory_space<vmem>>, vector<3x128xf32>
    tpu.vector_store %arg8[%c0_17, %c0_18], %37 {strides = array<i32>} : memref<3x128xf32, #tpu.memory_space<vmem>>, vector<3x128xf32>,
    return
  }
  func.func @transform_0(%arg0: i32) -> (i32, i32) {
    %c0_i32 = arith.constant 0 : i32
    %c0_i32_0 = arith.constant 0 : i32
    return %arg0, %c0_i32 : i32, i32
  }
  func.func @transform_1(%arg0: i32) -> (i32, i32) {
    %c0_i32 = arith.constant 0 : i32
    %c0_i32_0 = arith.constant 0 : i32
    %c0_i32_1 = arith.constant 0 : i32
    return %c0_i32, %c0_i32_0 : i32, i32
  }
  func.func @transform_2(%arg0: i32) -> (i32, i32) {
    %c0_i32 = arith.constant 0 : i32
    %c0_i32_0 = arith.constant 0 : i32
    %c0_i32_1 = arith.constant 0 : i32
    return %c0_i32, %c0_i32_0 : i32, i32
  }
  func.func @transform_3(%arg0: i32) -> (i32, i32) {
    %c0_i32 = arith.constant 0 : i32
    %c0_i32_0 = arith.constant 0 : i32
    %c0_i32_1 = arith.constant 0 : i32
    return %c0_i32, %c0_i32_0 : i32, i32
  }
  func.func @transform_4(%arg0: i32) -> (i32, i32) {
    %c0_i32 = arith.constant 0 : i32
    %c0_i32_0 = arith.constant 0 : i32
    %c0_i32_1 = arith.constant 0 : i32
    return %c0_i32, %c0_i32_0 : i32, i32
  }
  func.func @transform_5(%arg0: i32) -> (i32, i32) {
    %c0_i32 = arith.constant 0 : i32
    %c0_i32_0 = arith.constant 0 : i32
    %c0_i32_1 = arith.constant 0 : i32
    return %c0_i32, %c0_i32_0 : i32, i32
  }
  func.func @transform_6(%arg0: i32) -> (i32, i32) {
    %c0_i32 = arith.constant 0 : i32
    %c0_i32_0 = arith.constant 0 : i32
    %c0_i32_1 = arith.constant 0 : i32
    return %c0_i32, %c0_i32_0 : i32, i32
  }
  func.func @transform_7(%arg0: i32) -> (i32, i32) {
    %c0_i32 = arith.constant 0 : i32
    %c0_i32_0 = arith.constant 0 : i32
    return %c0_i32, %arg0 : i32, i32
  }
}

</mosaic_0001>

<bundles_post_ra>
// kernel: tpu_custom_call.1
= control target key start
LH: loop header
LB: loop body
LE: loop exit
PB: predicated region body
PF: predicated region fallthrough
CT: control target
= control target key end

     0   :  { %vm90_vm0 = vcmask 154624   ;;  %v437_v5 = vmov 0   ;;  %s594_s0 = inlined_call_operand.vmem [shape: f32[8,19], index: 0, kind: input, shape index: {}]   ;;  %s595_s1 = inlined_call_operand.vmem [shape: bf16[32,19], index: 1, kind: input, shape index: {}]   ;;  %s596_s2 = inlined_call_operand.vmem [shape: f32[32,1], index: 2, kind: input, shape index: {}]   ;;  %s597_s3 = inlined_call_operand.vmem [shape: bf16[16,32], index: 3, kind: input, shape index: {}]   ;;  %s598_s4 = inlined_call_operand.vmem [shape: f32[16,1], index: 4, kind: input, shape index: {}]   ;;  %s599_s5 = inlined_call_operand.vmem [shape: bf16[3,16], index: 5, kind: input, shape index: {}]   ;;  %s600_s6 = inlined_call_operand.vmem [shape: f32[3,1], index: 6, kind: input, shape index: {}]   ;;  %s601_s7 = inlined_call_operand.hbm [shape: f32[3,8], index: 7, kind: output, shape index: {}]  }
   0x1   :  { %v28_v0 = vld [vmem:[%s594_s0] sm:$0xff]  ;;  %v29_v1 = vld [vmem:[%s594_s0 + $0x8] sm:$0xff]  ;;  %v30_v2 = vld [vmem:[%s594_s0 + $0x10] sm:$0xff]  ;;  %404 = vset.pattern.permute.xlu0 %v437_v5  ;;  %405 = vset.pattern.permute.xlu1 %v437_v5 }
   0x2   :  { %v44_v3 = vpack.c.bf16 %v29_v1, %v28_v0  ;;  %v31_v4 = vld [vmem:[%s594_s0 + $0x18] sm:$0xff]  ;;  %v32_v8 = vld [vmem:[%s594_s0 + $0x20] sm:$0xff]  ;;  %v33_v9 = vld [vmem:[%s594_s0 + $0x28] sm:$0xff] }
   0x3   :  { %v45_v6 = vpack.c.bf16 %v31_v4, %v30_v2  ;;  %v406_v10 = vld [vmem:[%s595_s1] sm:$0xff]   ;;  %v58_v12 = vld [vmem:[%s596_s2 + $0x10] sm:$0xff]  ;;  %v46_v14 = vpack.c.bf16 %v33_v9, %v32_v8  ;;  %v57_v15 = vld [vmem:[%s596_s2 + $0x8] sm:$0xff] }
   0x4   :  { %392 = vmatprep.subr.msk.bf16.mxu0 %vm90_vm0, %v44_v3  ;;  %v98_v7 = vsel %vm90_vm0, %v44_v3, 0  ;;  %v56_v11 = vld [vmem:[%s596_s2] sm:$0xff]  ;;  %374 = vmatprep.mubr.msk.bf16.mxu0 %vm90_vm0, %v406_v10  ;;  %v59_v16 = vld [vmem:[%s596_s2 + $0x18] sm:$0xff] }
   0x5   :  { %359 = vmatpush3.bf16.xpose.msra.mxu0 %v98_v7  ;;  %62 = vperm.xlu0 %404, %v56_v11   ;;  %v101_v13 = vsel %vm90_vm0, %v45_v6, 0 }
   0x6   :  { %393 = vmatprep.subr.msk.bf16.mxu0 %vm90_vm0, %v45_v6  ;;  %72 = vperm.xlu1 %405, %v58_v12  }
   0x7   :  { %12 = vsyncpa [#allocation3], 0  ;;  %v178_v17 = vld [vmem:[%s598_s4] sm:$0xff]  ;;  %v34_v18 = vld [vmem:[%s594_s0 + $0x30] sm:$0xff]  ;;  %v104_v21 = vsel %vm90_vm0, %v46_v14, 0  ;;  %v438_v42 = vmov 0.0   ;;  %v301_v10 = vlaneseq }
   0x8   :  { %v35_v19 = vld [vmem:[%s594_s0 + $0x38] sm:$0xff]  ;;  %v179_v20 = vld [vmem:[%s598_s4 + $0x8] sm:$0xff]  ;;  %v244_v23 = vld [vmem:[%s600_s6] sm:$0x7]  ;;  %378 = vmatprep.subr.bf16.mxu1 %v438_v42  ;;  %vm439_vm1 = vmmov 0   ;;  %vm195_vm2 = vcmask 261120  }
   0x9   :  { %67 = vperm.xlu0 %404, %v57_v15   ;;  %v47_v22 = vpack.c.bf16 %v35_v19, %v34_v18  ;;  %v36_v24 = vld [vmem:[%s594_s0 + $0x40] sm:$0xff]  ;;  %v37_v25 = vld [vmem:[%s594_s0 + $0x48] sm:$0xff]  ;;  %v38_v28 = vld [vmem:[%s594_s0 + $0x50] sm:$0xff]  ;;  %382 = vmatprep.mubr.msk.bf16.mxu1 %vm439_vm1, %v438_v42  ;;  %vm250_vm3 = vcmask 130048  }
   0xa   :  { %77 = vperm.xlu1 %405, %v59_v16   ;;  %v48_v27 = vpack.c.bf16 %v37_v25, %v36_v24  ;;  %v39_v29 = vld [vmem:[%s594_s0 + $0x58] sm:$0xff]  ;;  %v40_v32 = vld [vmem:[%s594_s0 + $0x60] sm:$0xff]  ;;  %v41_v33 = vld [vmem:[%s594_s0 + $0x68] sm:$0xff] }
   0xb   :  { %v107_v26 = vsel %vm90_vm0, %v47_v22, 0  ;;  %v49_v31 = vpack.c.bf16 %v39_v29, %v38_v28  ;;  %v50_v35 = vpack.c.bf16 %v41_v33, %v40_v32  ;;  %v42_v36 = vld [vmem:[%s594_s0 + $0x70] sm:$0xff]  ;;  %v43_v37 = vld [vmem:[%s594_s0 + $0x78] sm:$0xff]  ;;  %v407_v41 = vld [vmem:[%s595_s1 + $0x8] sm:$0xff]  }
   0xc   :  { %v110_v30 = vsel %vm90_vm0, %v48_v27, 0  ;;  %v51_v39 = vpack.c.bf16 %v43_v37, %v42_v36  ;;  %v408_v61 = vld [vmem:[%s597_s3] sm:$0xff]  }
   0xd   :  { %361 = vmatpush3.bf16.xpose.msra.mxu0 %v101_v13  ;;  %182 = vperm.xlu0 %404, %v178_v17   ;;  %v113_v34 = vsel %vm90_vm0, %v49_v31, 0  ;;  %v116_v38 = vsel %vm90_vm0, %v50_v35, 0  ;;  %v242_v9 = vld [vmem:[%s599_s5] sm:$0x3]  ;;  %s440_s5 = smov [#allocation2]  }
   0xe   :  { %394 = vmatprep.subr.msk.bf16.mxu0 %vm90_vm0, %v46_v14  ;;  %187 = vperm.xlu1 %405, %v179_v20   ;;  %v119_v40 = vsel %vm90_vm0, %v51_v39, 0  ;;  %v302_v14 = vshrl.u32 %v301_v10, 7  ;;  %s328_s26 = sshll.u32 %s440_s5, 4  ;;  %s329_s26 = int_to_ptr.vmem [resolvable:$true] %s328_s26 }
   0xf   :  { %s413_s27 = scalar_lea.vmem %s329_s26, 64  ;;  %p418_p1 = scmp.lt.s32.totalorder %s329_s26, %s329_s26 }
  0x10   :  { %p414_p0 = scmp.ne.s32.totalorder %s329_s26, %s413_s27  ;;  %p419_p2 = scmp.lt.s32.totalorder %s413_s27, %s413_s27 }
  0x11   :  { %247 = vperm.xlu0 %404, %v244_v23  }
  0x12   :  { %p420_p3 = por %p419_p2, %p418_p1 }
  0x14   :  { %p421_p4 = pnand %p420_p3, %p414_p0 }
  0x15   :  { %363 = vmatpush3.bf16.xpose.msra.mxu0 %v104_v21  ;;  %v303_v21 = vsub.s32 0, %v302_v14 }
  0x16   :  { %395 = vmatprep.subr.msk.bf16.mxu0 %vm90_vm0, %v47_v22 }
  0x1d   :  { %365 = vmatpush3.bf16.xpose.msra.mxu0 %v107_v26 }
  0x1e   :  { %396 = vmatprep.subr.msk.bf16.mxu0 %vm90_vm0, %v48_v27 }
  0x25   :  { %367 = vmatpush3.bf16.xpose.msra.mxu0 %v110_v30 }
  0x26   :  { %397 = vmatprep.subr.msk.bf16.mxu0 %vm90_vm0, %v49_v31 }
  0x2d   :  { %369 = vmatpush3.bf16.xpose.msra.mxu0 %v113_v34 }
  0x2e   :  { %398 = vmatprep.subr.msk.bf16.mxu0 %vm90_vm0, %v50_v35 }
  0x35   :  { %371 = vmatpush3.bf16.xpose.msra.mxu0 %v116_v38 }
  0x36   :  { %399 = vmatprep.subr.msk.bf16.mxu0 %vm90_vm0, %v51_v39 }
  0x3d   :  { %373 = vmatpush3.bf16.xpose.msra.mxu0 %v119_v40 }
  0x44   :  { %375 = vmatmul.mubr.msk.bf16.vlgmr.msra.gmra.mrb[0].mxu0 %vm90_vm0, %v407_v41 }
  0x84   :  { %v63_v44 = vpop.permute.xlu0 %62 }
  0x85   :  { %v73_v43 = vpop.permute.xlu1 %72 }
  0x88   :  { %v68_v51 = vpop.permute.xlu0 %67 }
  0x89   :  { %v78_v48 = vpop.permute.xlu1 %77 }
  0x8c   :  { %v183_v62 = vpop.permute.xlu0 %182 }
  0x8d   :  { %v188_v2 = vpop.permute.xlu1 %187 }
  0x90   :  { %v248_v11 = vpop.permute.xlu0 %247 }
 0x117   :  { %v376_v45 = vpop.f32.mrb[0].mxu0 }
 0x118   :  { %v164_v46 = vadd.f32 %v376_v45, %v73_v43  ;;  %v155_v47 = vpop.f32.mrb[1].mxu0 }
 0x119   :  { %v156_v49 = vadd.f32 %v155_v47, %v63_v44  ;;  %v377_v50 = vpop.f32.mrb[2].mxu0 }
 0x11a   :  { %v167_v52 = vadd.f32 %v377_v50, %v78_v48  ;;  %v158_v53 = vpop.f32.mrb[3].mxu0  ;;  %v172_v55 = vmax.f32 %v164_v46, 0.0 }
 0x11b   :  { %v159_v54 = vadd.f32 %v158_v53, %v68_v51  ;;  %v170_v57 = vmax.f32 %v156_v49, 0.0 }
 0x11c   :  { %v173_v56 = vmax.f32 %v167_v52, 0.0 }
 0x11d   :  { %v171_v58 = vmax.f32 %v159_v54, 0.0 }
 0x11e   :  { %v177_v59 = vpack.c.bf16 %v173_v56, %v172_v55 }
 0x11f   :  { %v176_v60 = vpack.c.bf16 %v171_v58, %v170_v57 }
 0x121   :  { %379 = vmatpush3.bf16.msra.mxu1 %v176_v60 }
 0x122   :  { %380 = vmatprep.subr.bf16.mxu1 %v438_v42 }
 0x125   :  { %381 = vmatpush3.bf16.msra.mxu1 %v177_v59 }
 0x126   :  { %386 = vmatprep.subr.bf16.mxu1 %v438_v42 }
 0x128   :  { %383 = vmatmul.mubr.msk.bf16.vlgmr.msra.gmra.mrb[0].mxu1 %vm195_vm2, %v408_v61 }
 0x129   :  { %388 = vmatprep.mubr.msk.bf16.mxu1 %vm439_vm1, %v438_v42 }
 0x1fb   :  { %v233_v63 = vpop.f32.mrb[0].mxu1 }
 0x1fc   :  { %v234_v0 = vadd.f32 %v233_v63, %v183_v62  ;;  %v384_v1 = vpop.f32.mrb[1].mxu1 }
 0x1fd   :  { %v236_v3 = vpop.f32.mrb[2].mxu1 }
 0x1fe   :  { %v237_v4 = vadd.f32 %v236_v3, %v188_v2  ;;  %v385_v5 = vpop.f32.mrb[3].mxu1  ;;  %v240_v6 = vmax.f32 %v234_v0, 0.0 }
 0x200   :  { %v241_v7 = vmax.f32 %v237_v4, 0.0 }
 0x202   :  { %v243_v8 = vpack.c.bf16 %v241_v7, %v240_v6 }
 0x204   :  { %387 = vmatpush3.bf16.msra.mxu1 %v243_v8 }
 0x207   :  { %389 = vmatmul.mubr.msk.bf16.vlgmr.msra.gmra.mrb[4].mxu1 %vm250_vm3, %v242_v9 }
 0x2da   :  { %v288_v12 = vpop.f32.mrb[4].mxu1 }
 0x2db   :  { %v289_v13 = vadd.f32 %v288_v12, %v248_v11  ;;  %v390_v15 = vpop.f32.mrb[5].mxu1 }
 0x2dc   :  { %v291_v16 = vpop.f32.mrb[6].mxu1 }
 0x2dd   :  { %v295_v17 = vrot.slane %v289_v13, 1  ;;  %v391_v18 = vpop.f32.mrb[7].mxu1  ;;  %v298_v20 = vrot.slane %v289_v13, 2 }
 0x2df   :  { %v297_v19 = vmax.f32 %v289_v13, %v295_v17 }
 0x2e1   :  { %v300_v22 = vmax.f32 %v297_v19, %v298_v20 }
 0x2e3   :  { %v304_v23 = vrot.slane %v300_v22, %v303_v21 }
 0x2e5   :  { %v305_v24 = vsub.f32 %v289_v13, %v304_v23 }
 0x2e7   :  { %v306_v25 = vmul.f32 1.442695, %v305_v24 }
 0x2e9   :  { %409 = vpow2.f32 %v306_v25 }
 0x2f3   :  { %v410_v26 = vpop.eup %409 }
 0x2f4   :  { %v309_v27 = vrot.slane %v410_v26, 1  ;;  %v312_v29 = vrot.slane %v410_v26, 2 }
 0x2f6   :  { %v311_v28 = vadd.f32 %v410_v26, %v309_v27 }
 0x2f8   :  { %v314_v30 = vadd.f32 %v312_v29, %v311_v28 }
 0x2fa   :  { %v318_v31 = vrot.slane %v314_v30, %v303_v21 }
 0x2fc   :  { %411 = vrcp.f32 %v318_v31 }
 0x306   :  { %v412_v32 = vpop.eup %411 }
 0x307   :  { %v320_v33 = vmul.f32 %v412_v32, %v410_v26 }
 0x309   :  { %321 = vst [vmem:[#allocation2] sm:$0x7] %v320_v33 }
 0x30a   :  { %424 = shalt.err (!%p421_p4)
}
 0x30b   :  { %s425_s2 = scalar_lea.hbm %s601_s7, 64 }
 0x30c   :  { %p426_p5 = scmp.ne.s32.totalorder %s601_s7, %s425_s2  ;;  %p429_p6 = scmp.lt.u32.totalorder %s425_s2, %s601_s7 }
 0x30e   :  { %p431_p7 = pnand %p429_p6, %p426_p5 }
 0x310   :  { %434 = shalt.err (!%p431_p7)
}
 0x311   :  { %331 = dma.vmem_to_hbm [thread:$0]  %s329_s26, 64, %s601_s7, [#allocation3]  }
 0x312   :  { %435 = dma.done.wait [#allocation3], 64  }
 0x313   :  { %436 = vsyncadd [#allocation3], 4294967232 }
 0x314   :  { %335 = vsyncpa [#allocation3], 1 }

</bundles_post_ra>
